<compile_context>
chip_gen: v5e
topology: v5e:2x2
jax: 0.10.0
libtpu: 0.0.40
codegen_flags: <defaults>
</compile_context>

<pallas_src>
import jax
import jax.numpy as jnp
from jax import lax
from jax.experimental import pallas as pl
from jax.experimental.pallas import tpu as pltpu


def _round_up(x, m):
    return ((x + m - 1) // m) * m


def mlp_diffusion_kernel(x_ref, t_ref, e0_ref, e1_ref, e2_ref,
                         w1_ref, w2_ref, w3_ref, w4_ref, b4_ref, out_ref):
    x = x_ref[...]                      # (TB, D)  f32
    t = t_ref[...]                      # (TB, 1)  i32
    tb = x.shape[0]
    n_steps = e0_ref.shape[0]

    # In-kernel timestep-embedding gather as a one-hot matmul on the MXU:
    # onehot(t) @ emb_table == emb_table[t] (+ folded bias).  Exact in f32.
    onehot = (lax.broadcasted_iota(jnp.int32, (tb, n_steps), 1) == t
              ).astype(jnp.float32)     # (TB, n_steps)

    # Layer 1: x @ W1 + (b1 + emb0)[t]; ReLU.
    h = jnp.dot(x, w1_ref[...], preferred_element_type=jnp.float32)
    h = h + jnp.dot(onehot, e0_ref[...], preferred_element_type=jnp.float32)
    h = jnp.maximum(h, 0.0)

    # Layer 2: hidden matmul in w2's dtype (bf16 or f32), f32 accumulation;
    # elementwise math stays f32 (no bf16 VPU path on v5e).
    h2 = jnp.dot(h.astype(w2_ref.dtype), w2_ref[...],
                 preferred_element_type=jnp.float32)
    h2 = h2 + jnp.dot(onehot, e1_ref[...], preferred_element_type=jnp.float32)
    h = jnp.maximum(h2, 0.0)

    # Layer 3.
    h3 = jnp.dot(h.astype(w3_ref.dtype), w3_ref[...],
                 preferred_element_type=jnp.float32)
    h3 = h3 + jnp.dot(onehot, e2_ref[...], preferred_element_type=jnp.float32)
    h = jnp.maximum(h3, 0.0)

    # Final projection back to input_dim (+ b4).
    out = jnp.dot(h, w4_ref[...], preferred_element_type=jnp.float32) + b4_ref[...]
    out_ref[...] = out.astype(out_ref.dtype)


def init_params(key, input_dim, n_steps, num_units, dtype=jnp.float32):
    """Deterministic synthetic init mirroring the PyTorch module's shapes."""
    keys = jax.random.split(key, 12)

    def linear(kw, kb, fan_in, fan_out):
        bound = 1.0 / jnp.sqrt(fan_in)
        w = jax.random.uniform(kw, (fan_in, fan_out), dtype, -bound, bound)
        b = jax.random.uniform(kb, (fan_out,), dtype, -bound, bound)
        return w, b

    w1, b1 = linear(keys[0], keys[1], input_dim, num_units)
    w2, b2 = linear(keys[2], keys[3], num_units, num_units)
    w3, b3 = linear(keys[4], keys[5], num_units, num_units)
    w4, b4 = linear(keys[6], keys[7], num_units, input_dim)

    emb0 = jax.random.normal(keys[8], (n_steps, num_units), dtype)
    emb1 = jax.random.normal(keys[9], (n_steps, num_units), dtype)
    emb2 = jax.random.normal(keys[10], (n_steps, num_units), dtype)

    # Diffusion schedule buffers (unused by forward(), kept for fidelity).
    betas = jax.nn.sigmoid(jnp.linspace(-6.0, 6.0, n_steps)) * (0.005 - 1e-5) + 1e-5
    alphas = 1.0 - betas
    alphas_prod = jnp.cumprod(alphas)
    schedule = {
        "betas": betas,
        "alphas": alphas,
        "alphas_prod": alphas_prod,
        "alphas_bar_sqrt": jnp.sqrt(alphas_prod),
        "one_minus_alphas_bar_sqrt": jnp.sqrt(1.0 - alphas_prod),
    }

    return {
        "linears": [(w1, b1), (w2, b2), (w3, b3), (w4, b4)],
        "embs": [emb0, emb1, emb2],
        "schedule": schedule,
    }


def prepare_kernel_params(params, hidden_matmul_dtype=jnp.bfloat16):
    """One-time transform: fold b1/b2/b3 into the emb tables, cast the two
    128x128 hidden weights to the MXU-friendly dtype, reshape b4 to (1, D)."""
    (w1, b1), (w2, b2), (w3, b3), (w4, b4) = params["linears"]
    emb0, emb1, emb2 = params["embs"]
    return {
        "w1": w1.astype(jnp.float32),
        "w2": w2.astype(hidden_matmul_dtype),
        "w3": w3.astype(hidden_matmul_dtype),
        "w4": w4.astype(jnp.float32),
        "b4": b4.reshape(1, -1).astype(jnp.float32),
        "emb0": (emb0 + b1[None, :]).astype(jnp.float32),
        "emb1": (emb1 + b2[None, :]).astype(jnp.float32),
        "emb2": (emb2 + b3[None, :]).astype(jnp.float32),
    }


def mlp_diffusion_forward(x, t, kparams, *, block_b=1024):
    """Pallas-backed forward: x (B, input_dim) f32, t (B,) int32 -> (B, input_dim)."""
    w1, w2, w3, w4 = kparams["w1"], kparams["w2"], kparams["w3"], kparams["w4"]
    b4 = kparams["b4"]
    e0, e1, e2 = kparams["emb0"], kparams["emb1"], kparams["emb2"]

    B, D = x.shape
    n_steps, U = e0.shape

    # Batch tile: big (up to 1024) for MXU row occupancy / DMA efficiency,
    # multiple of 8 for f32 sublanes; pad B up to a multiple of the tile.
    TB = block_b if B >= block_b else max(8, _round_up(B, 8))
    B_pad = _round_up(B, TB)
    if B_pad != B:
        x = jnp.pad(x, ((0, B_pad - B), (0, 0)))
        t = jnp.pad(t, (0, B_pad - B))
    t2d = t.astype(jnp.int32).reshape(B_pad, 1)

    grid = (pl.cdiv(B_pad, TB),)
    tile = lambda i: (i, 0)
    const = lambda i: (0, 0)   # resident across grid steps

    in_specs = [
        pl.BlockSpec((TB, D), tile),         # x
        pl.BlockSpec((TB, 1), tile),         # t
        pl.BlockSpec((n_steps, U), const),   # emb0 (+ b1)
        pl.BlockSpec((n_steps, U), const),   # emb1 (+ b2)
        pl.BlockSpec((n_steps, U), const),   # emb2 (+ b3)
        pl.BlockSpec((D, U), const),         # w1
        pl.BlockSpec((U, U), const),         # w2
        pl.BlockSpec((U, U), const),         # w3
        pl.BlockSpec((U, D), const),         # w4
        pl.BlockSpec((1, D), const),         # b4
    ]
    out_specs = pl.BlockSpec((TB, D), tile)

    flops = 2 * B_pad * (D * U + 2 * U * U + U * D + 3 * n_steps * U)
    param_bytes = sum(int(a.size) * a.dtype.itemsize
                      for a in (w1, w2, w3, w4, b4, e0, e1, e2))
    io_bytes = (int(x.size) * x.dtype.itemsize          # x in
                + int(t2d.size) * 4                     # t in
                + B_pad * D * x.dtype.itemsize)         # out
    cost = pl.CostEstimate(flops=flops, transcendentals=0,
                           bytes_accessed=io_bytes + param_bytes)

    out = pl.pallas_call(
        mlp_diffusion_kernel,
        out_shape=jax.ShapeDtypeStruct((B_pad, D), x.dtype),
        grid_spec=pltpu.PrefetchScalarGridSpec(
            num_scalar_prefetch=0,
            grid=grid,
            in_specs=in_specs,
            out_specs=out_specs,
        ),
        compiler_params=pltpu.CompilerParams(
            dimension_semantics=("parallel",)),
        cost_estimate=cost,
    )(x, t2d, e0, e1, e2, w1, w2, w3, w4, b4)

    return out[:B] if B_pad != B else out


def mlp_diffusion_forward_ref(x, t, params):
    """Pure-JAX reference (original, un-folded parameterization)."""
    (w1, b1), (w2, b2), (w3, b3), (w4, b4) = params["linears"]
    emb0, emb1, emb2 = params["embs"]
    h = jnp.maximum(x @ w1 + b1 + emb0[t], 0.0)
    h = jnp.maximum(h @ w2 + b2 + emb1[t], 0.0)
    h = jnp.maximum(h @ w3 + b3 + emb2[t], 0.0)
    return h @ w4 + b4


if __name__ == "__main__":
    input_dim = 16
    num_units = 128
    n_steps = 100
    batch = 128   # matches the module's batch_size

    key = jax.random.PRNGKey(0)
    k_params, k_x, k_t = jax.random.split(key, 3)

    params = init_params(k_params, input_dim, n_steps, num_units)
    x = jax.random.normal(k_x, (batch, input_dim), jnp.float32)
    t = jax.random.randint(k_t, (batch,), 0, n_steps, jnp.int32)

    ref = mlp_diffusion_forward_ref(x, t, params)

    # All-f32 path: bit-for-bit-ish check of the kernel structure.
    kp_f32 = prepare_kernel_params(params, hidden_matmul_dtype=jnp.float32)
    out_f32 = jax.block_until_ready(mlp_diffusion_forward(x, t, kp_f32))
    assert out_f32.shape == (batch, input_dim)
    assert jnp.allclose(out_f32, ref, atol=1e-5, rtol=1e-5)

    # bf16 hidden-matmul path (MXU-native on v5e/v6e/v7x): loose tolerance.
    kp_bf16 = prepare_kernel_params(params, hidden_matmul_dtype=jnp.bfloat16)
    out_bf16 = jax.block_until_ready(mlp_diffusion_forward(x, t, kp_bf16))
    assert out_bf16.shape == (batch, input_dim)
    assert jnp.allclose(out_bf16, ref, atol=5e-2, rtol=5e-2)

    print("KERNEL_OK")
</pallas_src>

<mosaic_0001>
module attributes {stable_mosaic.version = 11 : i64} {
  func.func @mlp_diffusion_kernel(%arg0: i32, %arg1: memref<128x16xf32, #tpu.memory_space<vmem>>, %arg2: memref<128x1xi32, #tpu.memory_space<vmem>>, %arg3: memref<100x128xf32, #tpu.memory_space<vmem>>, %arg4: memref<100x128xf32, #tpu.memory_space<vmem>>, %arg5: memref<100x128xf32, #tpu.memory_space<vmem>>, %arg6: memref<16x128xf32, #tpu.memory_space<vmem>>, %arg7: memref<128x128xf32, #tpu.memory_space<vmem>>, %arg8: memref<128x128xf32, #tpu.memory_space<vmem>>, %arg9: memref<128x16xf32, #tpu.memory_space<vmem>>, %arg10: memref<1x16xf32, #tpu.memory_space<vmem>>, %arg11: memref<128x16xf32, #tpu.memory_space<vmem>>) attributes {dimension_semantics = [#tpu.dimension_semantics<parallel>], iteration_bounds = array<i64: 1>, scalar_prefetch = 0 : i64, scratch_operands = 0 : i64, tpu.core_type = #tpu.core_type<tc>, window_params = [{transform_indices = @transform_0, window_bounds = array<i64: 128, 16>}, {transform_indices = @transform_1, window_bounds = array<i64: 128, 1>}, {pipeline_mode = #tpu.pipeline_mode<synchronous>, transform_indices = @transform_2, window_bounds = array<i64: 100, 128>}, {pipeline_mode = #tpu.pipeline_mode<synchronous>, transform_indices = @transform_3, window_bounds = array<i64: 100, 128>}, {pipeline_mode = #tpu.pipeline_mode<synchronous>, transform_indices = @transform_4, window_bounds = array<i64: 100, 128>}, {pipeline_mode = #tpu.pipeline_mode<synchronous>, transform_indices = @transform_5, window_bounds = array<i64: 16, 128>}, {pipeline_mode = #tpu.pipeline_mode<synchronous>, transform_indices = @transform_6, window_bounds = array<i64: 128, 128>}, {pipeline_mode = #tpu.pipeline_mode<synchronous>, transform_indices = @transform_7, window_bounds = array<i64: 128, 128>}, {pipeline_mode = #tpu.pipeline_mode<synchronous>, transform_indices = @transform_8, window_bounds = array<i64: 128, 16>}, {pipeline_mode = #tpu.pipeline_mode<synchronous>, transform_indices = @transform_9, window_bounds = array<i64: 1, 16>}, {transform_indices = @transform_10, window_bounds = array<i64: 128, 16>}]} {
    %c0 = arith.constant 0 : index
    %c0_0 = arith.constant 0 : index
    %0 = vector.load %arg1[%c0, %c0_0] : memref<128x16xf32, #tpu.memory_space<vmem>>, vector<128x16xf32>
    %c0_1 = arith.constant 0 : index
    %c0_2 = arith.constant 0 : index
    %1 = vector.load %arg2[%c0_1, %c0_2] : memref<128x1xi32, #tpu.memory_space<vmem>>, vector<128x1xi32>
    %2 = tpu.iota {dimensions = array<i32: 1>} : vector<128x100xi32>
    %3 = vector.broadcast %1 : vector<128x1xi32> to vector<128x100xi32>
    %4 = arith.cmpi eq, %2, %3 : vector<128x100xi32>
    %5 = arith.extui %4 : vector<128x100xi1> to vector<128x100xi32>
    %6 = arith.sitofp %5 : vector<128x100xi32> to vector<128x100xf32>
    %c0_3 = arith.constant 0 : index
    %c0_4 = arith.constant 0 : index
    %7 = vector.load %arg6[%c0_3, %c0_4] : memref<16x128xf32, #tpu.memory_space<vmem>>, vector<16x128xf32>
    %cst = arith.constant dense<0.000000e+00> : vector<128x128xf32>
    %8 = tpu.matmul %0, %7, %cst {dimension_numbers = #tpu.dot_dimension_numbers<[1], [0], [0], [1], [0, 0, 1, 1], [], []>} : vector<128x16xf32>, vector<16x128xf32>, vector<128x128xf32> -> vector<128x128xf32>
    %c0_5 = arith.constant 0 : index
    %c0_6 = arith.constant 0 : index
    %9 = vector.load %arg3[%c0_5, %c0_6] : memref<100x128xf32, #tpu.memory_space<vmem>>, vector<100x128xf32>
    %cst_7 = arith.constant dense<0.000000e+00> : vector<128x128xf32>
    %10 = tpu.matmul %6, %9, %cst_7 {dimension_numbers = #tpu.dot_dimension_numbers<[1], [0], [0], [1], [0, 0, 1, 1], [], []>} : vector<128x100xf32>, vector<100x128xf32>, vector<128x128xf32> -> vector<128x128xf32>
    %11 = arith.addf %8, %10 : vector<128x128xf32>
    %cst_8 = arith.constant 0.000000e+00 : f32
    %12 = vector.broadcast %cst_8 : f32 to vector<128x128xf32>
    %13 = arith.maximumf %11, %12 : vector<128x128xf32>
    %c0_9 = arith.constant 0 : index
    %c0_10 = arith.constant 0 : index
    %14 = vector.load %arg7[%c0_9, %c0_10] : memref<128x128xf32, #tpu.memory_space<vmem>>, vector<128x128xf32>
    %cst_11 = arith.constant dense<0.000000e+00> : vector<128x128xf32>
    %15 = tpu.matmul %13, %14, %cst_11 {dimension_numbers = #tpu.dot_dimension_numbers<[1], [0], [0], [1], [0, 0, 1, 1], [], []>} : vector<128x128xf32>, vector<128x128xf32>, vector<128x128xf32> -> vector<128x128xf32>
    %c0_12 = arith.constant 0 : index
    %c0_13 = arith.constant 0 : index
    %16 = vector.load %arg4[%c0_12, %c0_13] : memref<100x128xf32, #tpu.memory_space<vmem>>, vector<100x128xf32>
    %cst_14 = arith.constant dense<0.000000e+00> : vector<128x128xf32>
    %17 = tpu.matmul %6, %16, %cst_14 {dimension_numbers = #tpu.dot_dimension_numbers<[1], [0], [0], [1], [0, 0, 1, 1], [], []>} : vector<128x100xf32>, vector<100x128xf32>, vector<128x128xf32> -> vector<128x128xf32>
    %18 = arith.addf %15, %17 : vector<128x128xf32>
    %cst_15 = arith.constant 0.000000e+00 : f32
    %19 = vector.broadcast %cst_15 : f32 to vector<128x128xf32>
    %20 = arith.maximumf %18, %19 : vector<128x128xf32>
    %c0_16 = arith.constant 0 : index
    %c0_17 = arith.constant 0 : index
    %21 = vector.load %arg8[%c0_16, %c0_17] : memref<128x128xf32, #tpu.memory_space<vmem>>, vector<128x128xf32>
    %cst_18 = arith.constant dense<0.000000e+00> : vector<128x128xf32>
    %22 = tpu.matmul %20, %21, %cst_18 {dimension_numbers = #tpu.dot_dimension_numbers<[1], [0], [0], [1], [0, 0, 1, 1], [], []>} : vector<128x128xf32>, vector<128x128xf32>, vector<128x128xf32> -> vector<128x128xf32>
    %c0_19 = arith.constant 0 : index
    %c0_20 = arith.constant 0 : index
    %23 = vector.load %arg5[%c0_19, %c0_20] : memref<100x128xf32, #tpu.memory_space<vmem>>, vector<100x128xf32>
    %cst_21 = arith.constant dense<0.000000e+00> : vector<128x128xf32>
    %24 = tpu.matmul %6, %23, %cst_21 {dimension_numbers = #tpu.dot_dimension_numbers<[1], [0], [0], [1], [0, 0, 1, 1], [], []>} : vector<128x100xf32>, vector<100x128xf32>, vector<128x128xf32> -> vector<128x128xf32>
    %25 = arith.addf %22, %24 : vector<128x128xf32>
    %cst_22 = arith.constant 0.000000e+00 : f32
    %26 = vector.broadcast %cst_22 : f32 to vector<128x128xf32>
    %27 = arith.maximumf %25, %26 : vector<128x128xf32>
    %c0_23 = arith.constant 0 : index
    %c0_24 = arith.constant 0 : index
    %28 = vector.load %arg9[%c0_23, %c0_24] : memref<128x16xf32, #tpu.memory_space<vmem>>, vector<128x16xf32>
    %cst_25 = arith.constant dense<0.000000e+00> : vector<128x16xf32>
    %29 = tpu.matmul %27, %28, %cst_25 {dimension_numbers = #tpu.dot_dimension_numbers<[1], [0], [0], [1], [0, 0, 1, 1], [], []>} : vector<128x128xf32>, vector<128x16xf32>, vector<128x16xf32> -> vector<128x16xf32>
    %c0_26 = arith.constant 0 : index
    %c0_27 = arith.constant 0 : index
    %30 = vector.load %arg10[%c0_26, %c0_27] : memref<1x16xf32, #tpu.memory_space<vmem>>, vector<1x16xf32>
    %31 = vector.broadcast %30 : vector<1x16xf32> to vector<128x16xf32>
    %32 = arith.addf %29, %31 : vector<128x16xf32>
    %c0_28 = arith.constant 0 : index
    %c0_29 = arith.constant 0 : index
    %33 = vector.load %arg11[%c0_28, %c0_29] : memref<128x16xf32, #tpu.memory_space<vmem>>, vector<128x16xf32>
    tpu.vector_store %arg11[%c0_28, %c0_29], %32 {strides = array<i32>} : memref<128x16xf32, #tpu.memory_space<vmem>>, vector<128x16xf32>,
    return
  }
  func.func @transform_0(%arg0: i32) -> (i32, i32) {
    %c0_i32 = arith.constant 0 : i32
    %c0_i32_0 = arith.constant 0 : i32
    return %arg0, %c0_i32 : i32, i32
  }
  func.func @transform_1(%arg0: i32) -> (i32, i32) {
    %c0_i32 = arith.constant 0 : i32
    %c0_i32_0 = arith.constant 0 : i32
    return %arg0, %c0_i32 : i32, i32
  }
  func.func @transform_2(%arg0: i32) -> (i32, i32) {
    %c0_i32 = arith.constant 0 : i32
    %c0_i32_0 = arith.constant 0 : i32
    %c0_i32_1 = arith.constant 0 : i32
    return %c0_i32, %c0_i32_0 : i32, i32
  }
  func.func @transform_3(%arg0: i32) -> (i32, i32) {
    %c0_i32 = arith.constant 0 : i32
    %c0_i32_0 = arith.constant 0 : i32
    %c0_i32_1 = arith.constant 0 : i32
    return %c0_i32, %c0_i32_0 : i32, i32
  }
  func.func @transform_4(%arg0: i32) -> (i32, i32) {
    %c0_i32 = arith.constant 0 : i32
    %c0_i32_0 = arith.constant 0 : i32
    %c0_i32_1 = arith.constant 0 : i32
    return %c0_i32, %c0_i32_0 : i32, i32
  }
  func.func @transform_5(%arg0: i32) -> (i32, i32) {
    %c0_i32 = arith.constant 0 : i32
    %c0_i32_0 = arith.constant 0 : i32
    %c0_i32_1 = arith.constant 0 : i32
    return %c0_i32, %c0_i32_0 : i32, i32
  }
  func.func @transform_6(%arg0: i32) -> (i32, i32) {
    %c0_i32 = arith.constant 0 : i32
    %c0_i32_0 = arith.constant 0 : i32
    %c0_i32_1 = arith.constant 0 : i32
    return %c0_i32, %c0_i32_0 : i32, i32
  }
  func.func @transform_7(%arg0: i32) -> (i32, i32) {
    %c0_i32 = arith.constant 0 : i32
    %c0_i32_0 = arith.constant 0 : i32
    %c0_i32_1 = arith.constant 0 : i32
    return %c0_i32, %c0_i32_0 : i32, i32
  }
  func.func @transform_8(%arg0: i32) -> (i32, i32) {
    %c0_i32 = arith.constant 0 : i32
    %c0_i32_0 = arith.constant 0 : i32
    %c0_i32_1 = arith.constant 0 : i32
    return %c0_i32, %c0_i32_0 : i32, i32
  }
  func.func @transform_9(%arg0: i32) -> (i32, i32) {
    %c0_i32 = arith.constant 0 : i32
    %c0_i32_0 = arith.constant 0 : i32
    %c0_i32_1 = arith.constant 0 : i32
    return %c0_i32, %c0_i32_0 : i32, i32
  }
  func.func @transform_10(%arg0: i32) -> (i32, i32) {
    %c0_i32 = arith.constant 0 : i32
    %c0_i32_0 = arith.constant 0 : i32
    return %arg0, %c0_i32 : i32, i32
  }
}

</mosaic_0001>

<bundles_post_ra>
// kernel: tpu_custom_call.1
= control target key start
LH: loop header
LB: loop body
LE: loop exit
PB: predicated region body
PF: predicated region fallthrough
CT: control target
= control target key end

     0   :  { %15 = vsyncpa [#allocation3], 0  ;;  %s1693_s0 = inlined_call_operand.vmem [shape: f32[128,16], index: 0, kind: input, shape index: {}]   ;;  %s1694_s1 = inlined_call_operand.vmem [shape: s32[128,1], index: 1, kind: input, shape index: {}]   ;;  %s1695_s2 = inlined_call_operand.vmem [shape: f32[100,128], index: 2, kind: input, shape index: {}]   ;;  %s1696_s3 = inlined_call_operand.hbm [shape: f32[100,128], index: 3, kind: input, shape index: {}]   ;;  %s1697_s4 = inlined_call_operand.hbm [shape: f32[100,128], index: 4, kind: input, shape index: {}]   ;;  %s1698_s5 = inlined_call_operand.vmem [shape: f32[16,128], index: 5, kind: input, shape index: {}]   ;;  %s1699_s6 = inlined_call_operand.vmem [shape: f32[128,128], index: 6, kind: input, shape index: {}]   ;;  %s1700_s7 = inlined_call_operand.vmem [shape: f32[128,128], index: 7, kind: input, shape index: {}]   ;;  %s1701_s8 = inlined_call_operand.vmem [shape: f32[128,16], index: 8, kind: input, shape index: {}]   ;;  %s1702_s9 = inlined_call_operand.vmem [shape: f32[1,16], index: 9, kind: input, shape index: {}]   ;;  %s1703_s10 = inlined_call_operand.vmem [shape: f32[128,16], index: 10, kind: output, shape index: {}]  }
   0x1   :  { %s27_s15 = sshll.u32 %s1696_s3, 4  ;;  %s28_s15 = int_to_ptr.hbm [resolvable:$true] %s27_s15 }
   0x2   :  { %16 = vsyncpa [#allocation5], 0  ;;  %s1094_s16 = smov [#allocation2]   ;;  %s40_s20 = sshll.u32 %s1697_s4, 4  ;;  %s41_s20 = int_to_ptr.hbm [resolvable:$true] %s40_s20 }
   0x3   :  { %s29_s17 = sshll.u32 %s1094_s16, 4  ;;  %s1095_s21 = smov 128   ;;  %s30_s17 = int_to_ptr.vmem [resolvable:$true] %s29_s17 }
   0x4   :  { %s1096_s22 = smov 8   ;;  %s1097_s23 = smov [#allocation4]  }
   0x5   :  { %35 = dma.hbm_to_vmem [thread:$0]  %s28_s15, 1664, %s30_s17, [#allocation3], %s1095_s21, %s1095_s21, %s1096_s22  }
   0x6   :  { %s42_s24 = sshll.u32 %s1097_s23, 4  ;;  %s43_s24 = int_to_ptr.vmem [resolvable:$true] %s42_s24 }
   0x7   :  { %48 = dma.hbm_to_vmem [thread:$0]  %s41_s20, 1664, %s43_s24, [#allocation5], %s1095_s21, %s1095_s21, %s1096_s22  }
   0x8   :  { %1090 = dma.done.wait [#allocation3], 1664  }
   0x9   :  { %1091 = vsyncadd [#allocation3], 4294965632 }
   0xa   :  { %1092 = dma.done.wait [#allocation5], 1664  }
   0xb   :  { %1093 = vsyncadd [#allocation5], 4294965632  ;;  %v1098_v0 = vmov 0   ;;  %v198_v1 = vld [vmem:[%s1698_s5 + $0x8] sm:$0xff]  ;;  %v85_v2 = vld [vmem:[%s1694_s1 + $0x10] sm:$0xff]  ;;  %vm330_vm0 = vcmask 130048   ;;  %v99_v62 = vlaneseq }
   0xc   :  { %1039 = vset.pattern.permute.xlu1 %v1098_v0  ;;  %1038 = vset.pattern.permute.xlu0 %v1098_v0  ;;  %v83_v3 = vld [vmem:[%s1694_s1] sm:$0xff]  ;;  %v86_v7 = vld [vmem:[%s1694_s1 + $0x18] sm:$0xff]  ;;  %v84_v8 = vld [vmem:[%s1694_s1 + $0x8] sm:$0xff]  ;;  %vm261_vm1 = vcmask 1043456   ;;  %vm212_vm2 = vcmask 818176  }
   0xd   :  { %1040 = vset.pattern.permute.xlu2 %v1098_v0  ;;  %393 = vmatpush.msra.mxu1 %v198_v1  ;;  %v197_v4 = vld [vmem:[%s1698_s5] sm:$0xff]  ;;  %v68_v9 = vld [vmem:[%s1693_s0 + $0x8] sm:$0xff]  ;;  %v90_v11 = vld [vmem:[%s1694_s1 + $0x38] sm:$0xff] }
   0xe   :  { %108 = vperm.xlu1 %1039, %v85_v2   ;;  %v67_v5 = vld [vmem:[%s1693_s0] sm:$0xff]  ;;  %102 = vperm.xlu0 %1038, %v83_v3   ;;  %v88_v10 = vld [vmem:[%s1694_s1 + $0x28] sm:$0xff]  ;;  %v89_v12 = vld [vmem:[%s1694_s1 + $0x30] sm:$0xff]  ;;  %v1341_v3 = vand.u32 127, %v99_v62 }
   0xf   :  { %394 = vmatpush.msra.mxu1 %v197_v4  ;;  %v87_v6 = vld [vmem:[%s1694_s1 + $0x20] sm:$0xff]  ;;  %v69_v13 = vld [vmem:[%s1693_s0 + $0x10] sm:$0xff]  ;;  %v92_v16 = vld [vmem:[%s1694_s1 + $0x48] sm:$0xff] }
  0x10   :  { %956 = vmatmul.msk.f32.vlgmr.msra.gmra.mxu1 %vm330_vm0, %v67_v5  ;;  %114 = vperm.xlu2 %1040, %v87_v6   ;;  %v91_v14 = vld [vmem:[%s1694_s1 + $0x40] sm:$0xff]  ;;  %v93_v15 = vld [vmem:[%s1694_s1 + $0x50] sm:$0xff]  ;;  %v70_v17 = vld [vmem:[%s1693_s0 + $0x18] sm:$0xff] }
  0x11   :  { %v94_v18 = vld [vmem:[%s1694_s1 + $0x58] sm:$0xff]  ;;  %v96_v19 = vld [vmem:[%s1694_s1 + $0x68] sm:$0xff]  ;;  %v95_v20 = vld [vmem:[%s1694_s1 + $0x60] sm:$0xff] }
  0x12   :  { %v71_v21 = vld [vmem:[%s1693_s0 + $0x20] sm:$0xff]  ;;  %v97_v22 = vld [vmem:[%s1694_s1 + $0x70] sm:$0xff]  ;;  %v98_v23 = vld [vmem:[%s1694_s1 + $0x78] sm:$0xff] }
  0x13   :  { %v72_v24 = vld [vmem:[%s1693_s0 + $0x28] sm:$0xff]  ;;  %v73_v25 = vld [vmem:[%s1693_s0 + $0x30] sm:$0xff]  ;;  %v74_v26 = vld [vmem:[%s1693_s0 + $0x38] sm:$0xff] }
  0x14   :  { %v211_v27 = vld [vmem:[%s1695_s2 + $0x60] sm:$0xf]  ;;  %v210_v29 = vld [vmem:[%s1695_s2 + $0x58] sm:$0xff]  ;;  %v209_v31 = vld [vmem:[%s1695_s2 + $0x50] sm:$0xff] }
  0x15   :  { %v1250_v28 = vld [vmem:[#allocation2 + $0x60] sm:$0xf]  ;;  %939 = vmatpush.msk.msra.mxu0 %vm261_vm1, %v211_v27  ;;  %1006 = vmatpush.msk.msra.mxu3 %vm261_vm1, %v211_v27  ;;  %v1257_v30 = vld [vmem:[#allocation2 + $0x58] sm:$0xff]  ;;  %v1264_v32 = vld [vmem:[#allocation2 + $0x50] sm:$0xff] }
  0x16   :  { %111 = vperm.xlu1 %1039, %v86_v7   ;;  %105 = vperm.xlu0 %1038, %v84_v8   ;;  %v208_v33 = vld [vmem:[%s1695_s2 + $0x48] sm:$0xff]  ;;  %v75_v34 = vld [vmem:[%s1693_s0 + $0x40] sm:$0xff]  ;;  %v206_v38 = vld [vmem:[%s1695_s2 + $0x38] sm:$0xff]  ;;  %v1099_v7 = vmov 0.0  }
  0x17   :  { %1019 = vmatpush.msk.msra.mxu2 %vm261_vm1, %v1250_v28  ;;  %269 = vmatpush.msra.mxu0 %v210_v29  ;;  %v1273_v35 = vld [vmem:[#allocation2 + $0x48] sm:$0xff]  ;;  %v207_v36 = vld [vmem:[%s1695_s2 + $0x40] sm:$0xff]  ;;  %v1286_v39 = vld [vmem:[#allocation2 + $0x38] sm:$0xff] }
  0x18   :  { %957 = vmatmul.msk.f32.gmra.mxu1 %vm330_vm0, %v68_v9  ;;  %117 = vperm.xlu2 %1040, %v88_v10   ;;  %v1281_v37 = vld [vmem:[#allocation2 + $0x40] sm:$0xff]  ;;  %v205_v40 = vld [vmem:[%s1695_s2 + $0x30] sm:$0xff]  ;;  %v666_v41 = vld [vmem:[#allocation4 + $0x60] sm:$0xf] }
  0x19   :  { %1007 = vmatpush.msra.mxu3 %v210_v29  ;;  %1020 = vmatpush.msra.mxu2 %v1257_v30  ;;  %v1292_v42 = vld [vmem:[#allocation2 + $0x30] sm:$0xff]  ;;  %v204_v43 = vld [vmem:[%s1695_s2 + $0x28] sm:$0xff]  ;;  %v203_v46 = vld [vmem:[%s1695_s2 + $0x20] sm:$0xff] }
  0x1a   :  { %270 = vmatpush.msra.mxu0 %v209_v31  ;;  %989 = vmatpush.msk.msrb.mxu1 %vm261_vm1, %v666_v41  ;;  %v76_v44 = vld [vmem:[%s1693_s0 + $0x48] sm:$0xff]  ;;  %v1310_v47 = vld [vmem:[#allocation2 + $0x20] sm:$0xff]  ;;  %v202_v49 = vld [vmem:[%s1695_s2 + $0x18] sm:$0xff] }
  0x1b   :  { %1008 = vmatpush.msra.mxu3 %v209_v31  ;;  %1021 = vmatpush.msra.mxu2 %v1264_v32  ;;  %v1302_v45 = vld [vmem:[#allocation2 + $0x28] sm:$0xff]  ;;  %v665_v48 = vld [vmem:[#allocation4 + $0x58] sm:$0xff]  ;;  %v1315_v50 = vld [vmem:[#allocation2 + $0x18] sm:$0xff] }
  0x1c   :  { %271 = vmatpush.msra.mxu0 %v208_v33  ;;  %v664_v51 = vld [vmem:[#allocation4 + $0x50] sm:$0xff]  ;;  %674 = vmatpush.msrb.mxu1 %v665_v48  ;;  %v201_v52 = vld [vmem:[%s1695_s2 + $0x10] sm:$0xff]  ;;  %v200_v55 = vld [vmem:[%s1695_s2 + $0x8] sm:$0xff] }
  0x1d   :  { %1009 = vmatpush.msra.mxu3 %v208_v33  ;;  %1022 = vmatpush.msra.mxu2 %v1273_v35  ;;  %v1321_v53 = vld [vmem:[#allocation2 + $0x10] sm:$0xff]  ;;  %v477_v57 = vld [vmem:[#allocation2 + $0x8] sm:$0xff]  ;;  %v199_v59 = vld [vmem:[%s1695_s2] sm:$0xff] }
  0x1e   :  { %123 = vperm.xlu1 %1039, %v90_v11   ;;  %120 = vperm.xlu0 %1038, %v89_v12   ;;  %v663_v54 = vld [vmem:[#allocation4 + $0x48] sm:$0xff]  ;;  %v662_v58 = vld [vmem:[#allocation4 + $0x40] sm:$0xff]  ;;  %v476_v60 = vld [vmem:[#allocation2] sm:$0xff] }
  0x1f   :  { %272 = vmatpush.msra.mxu0 %v207_v36  ;;  %1010 = vmatpush.msra.mxu3 %v207_v36  ;;  %v77_v56 = vld [vmem:[%s1693_s0 + $0x50] sm:$0xff]  ;;  %v661_v61 = vld [vmem:[#allocation4 + $0x38] sm:$0xff]  ;;  %v660_v63 = vld [vmem:[#allocation4 + $0x30] sm:$0xff] }
  0x20   :  { %958 = vmatmul.msk.f32.gmra.mxu1 %vm330_vm0, %v69_v13  ;;  %126 = vperm.xlu2 %1040, %v91_v14   ;;  %v659_v0 = vld [vmem:[#allocation4 + $0x28] sm:$0xff]  ;;  %v78_v1 = vld [vmem:[%s1693_s0 + $0x58] sm:$0xff]  ;;  %v658_v2 = vld [vmem:[#allocation4 + $0x20] sm:$0xff] }
  0x21   :  { %1023 = vmatpush.msra.mxu2 %v1281_v37  ;;  %273 = vmatpush.msra.mxu0 %v206_v38  ;;  %v657_v4 = vld [vmem:[#allocation4 + $0x18] sm:$0xff]  ;;  %v656_v6 = vld [vmem:[#allocation4 + $0x10] sm:$0xff]  ;;  %v655_v10 = vld [vmem:[#allocation4 + $0x8] sm:$0xff] }
  0x22   :  { %1011 = vmatpush.msra.mxu3 %v206_v38  ;;  %675 = vmatpush.msrb.mxu1 %v664_v51  ;;  %v79_v9 = vld [vmem:[%s1693_s0 + $0x60] sm:$0xff]  ;;  %v654_v11 = vld [vmem:[#allocation4] sm:$0xff]  ;;  %v474_v29 = vld [vmem:[%s1699_s6 + $0x70] sm:$0xff] }
  0x23   :  { %1024 = vmatpush.msra.mxu2 %v1286_v39  ;;  %274 = vmatpush.msra.mxu0 %v205_v40  ;;  %v80_v14 = vld [vmem:[%s1693_s0 + $0x68] sm:$0xff]  ;;  %v471_v41 = vld [vmem:[%s1699_s6 + $0x58] sm:$0xff] }
  0x24   :  { %1012 = vmatpush.msra.mxu3 %v205_v40  ;;  %676 = vmatpush.msrb.mxu1 %v663_v54  ;;  %v469_v48 = vld [vmem:[%s1699_s6 + $0x48] sm:$0xff]  ;;  %v466_v54 = vld [vmem:[%s1699_s6 + $0x30] sm:$0xff] }
  0x25   :  { %1025 = vmatpush.msra.mxu2 %v1292_v42  ;;  %275 = vmatpush.msra.mxu0 %v204_v43 }
  0x26   :  { %132 = vperm.xlu1 %1039, %v93_v15   ;;  %129 = vperm.xlu0 %1038, %v92_v16   ;;  %v81_v16 = vld [vmem:[%s1693_s0 + $0x70] sm:$0xff] }
  0x27   :  { %1013 = vmatpush.msra.mxu3 %v204_v43  ;;  %1026 = vmatpush.msra.mxu2 %v1302_v45 }
  0x28   :  { %959 = vmatmul.msk.f32.gmra.mxu1 %vm330_vm0, %v70_v17  ;;  %135 = vperm.xlu2 %1040, %v94_v18  }
  0x29   :  { %276 = vmatpush.msra.mxu0 %v203_v46  ;;  %1014 = vmatpush.msra.mxu3 %v203_v46 }
  0x2a   :  { %1027 = vmatpush.msra.mxu2 %v1310_v47  ;;  %677 = vmatpush.msrb.mxu1 %v662_v58  ;;  %v463_v58 = vld [vmem:[%s1699_s6 + $0x18] sm:$0xff] }
  0x2b   :  { %277 = vmatpush.msra.mxu0 %v202_v49  ;;  %1015 = vmatpush.msra.mxu3 %v202_v49 }
  0x2c   :  { %1028 = vmatpush.msra.mxu2 %v1315_v50  ;;  %678 = vmatpush.msrb.mxu1 %v661_v61  ;;  %v461_v61 = vld [vmem:[%s1699_s6 + $0x8] sm:$0xff] }
  0x2d   :  { %278 = vmatpush.msra.mxu0 %v201_v52  ;;  %1016 = vmatpush.msra.mxu3 %v201_v52  ;;  %v468_v52 = vld [vmem:[%s1699_s6 + $0x40] sm:$0xff] }
  0x2e   :  { %141 = vperm.xlu1 %1039, %v96_v19   ;;  %138 = vperm.xlu0 %1038, %v95_v20  }
  0x2f   :  { %1029 = vmatpush.msra.mxu2 %v1321_v53  ;;  %279 = vmatpush.msra.mxu0 %v200_v55 }
  0x30   :  { %960 = vmatmul.msk.f32.gmra.mxu1 %vm330_vm0, %v71_v21  ;;  %144 = vperm.xlu2 %1040, %v97_v22   ;;  %v475_v22 = vld [vmem:[%s1699_s6 + $0x78] sm:$0xff] }
  0x31   :  { %1017 = vmatpush.msra.mxu3 %v200_v55  ;;  %1030 = vmatpush.msra.mxu2 %v477_v57  ;;  %v465_v55 = vld [vmem:[%s1699_s6 + $0x28] sm:$0xff] }
  0x32   :  { %280 = vmatpush.msra.mxu0 %v199_v59  ;;  %679 = vmatpush.msrb.mxu1 %v660_v63  ;;  %v460_v63 = vld [vmem:[%s1699_s6] sm:$0xff] }
  0x33   :  { %1018 = vmatpush.msra.mxu3 %v199_v59  ;;  %1031 = vmatpush.msra.mxu2 %v476_v60 }
  0x34   :  { %972 = vmatpush.msk.msrb.mxu0 %vm261_vm1, %v1250_v28  ;;  %680 = vmatpush.msrb.mxu1 %v659_v0 }
  0x35   :  { %557 = vmatpush.msrb.mxu3 %v475_v22 }
  0x36   :  { %147 = vperm.xlu0 %1038, %v98_v23   ;;  %496 = vmatpush.msrb.mxu0 %v1257_v30  ;;  %v82_v23 = vld [vmem:[%s1693_s0 + $0x78] sm:$0xff]  ;;  %v473_v30 = vld [vmem:[%s1699_s6 + $0x68] sm:$0xff] }
  0x37   :  { %681 = vmatpush.msrb.mxu1 %v658_v2  ;;  %558 = vmatpush.msrb.mxu3 %v474_v29 }
  0x38   :  { %961 = vmatmul.msk.f32.gmra.mxu1 %vm330_vm0, %v72_v24  ;;  %497 = vmatpush.msrb.mxu0 %v1264_v32 }
  0x39   :  { %682 = vmatpush.msrb.mxu1 %v657_v4  ;;  %559 = vmatpush.msrb.mxu3 %v473_v30 }
  0x3a   :  { %498 = vmatpush.msrb.mxu0 %v1273_v35  ;;  %v472_v35 = vld [vmem:[%s1699_s6 + $0x60] sm:$0xff] }
  0x3b   :  { %683 = vmatpush.msrb.mxu1 %v656_v6  ;;  %560 = vmatpush.msrb.mxu3 %v472_v35 }
  0x3c   :  { %499 = vmatpush.msrb.mxu0 %v1281_v37 }
  0x3d   :  { %684 = vmatpush.msrb.mxu1 %v655_v10  ;;  %561 = vmatpush.msrb.mxu3 %v471_v41  ;;  %v652_v41 = vld [vmem:[%s1700_s7 + $0x70] sm:$0xff] }
  0x3e   :  { %500 = vmatpush.msrb.mxu0 %v1286_v39 }
  0x3f   :  { %685 = vmatpush.msrb.mxu1 %v654_v11 }
  0x40   :  { %962 = vmatmul.msk.f32.gmra.mxu1 %vm330_vm0, %v73_v25  ;;  %501 = vmatpush.msrb.mxu0 %v1292_v42 }
  0x42   :  { %502 = vmatpush.msrb.mxu0 %v1302_v45 }
  0x44   :  { %503 = vmatpush.msrb.mxu0 %v1310_v47  ;;  %v470_v47 = vld [vmem:[%s1699_s6 + $0x50] sm:$0xff] }
  0x45   :  { %562 = vmatpush.msrb.mxu3 %v470_v47  ;;  %v649_v47 = vld [vmem:[%s1700_s7 + $0x58] sm:$0xff] }
  0x46   :  { %504 = vmatpush.msrb.mxu0 %v1315_v50 }
  0x47   :  { %563 = vmatpush.msrb.mxu3 %v469_v48  ;;  %v648_v48 = vld [vmem:[%s1700_s7 + $0x50] sm:$0xff] }
  0x48   :  { %963 = vmatmul.msk.f32.gmra.mxu1 %vm330_vm0, %v74_v26  ;;  %505 = vmatpush.msrb.mxu0 %v1321_v53  ;;  %v467_v53 = vld [vmem:[%s1699_s6 + $0x38] sm:$0xff] }
  0x49   :  { %564 = vmatpush.msrb.mxu3 %v468_v52 }
  0x4a   :  { %506 = vmatpush.msrb.mxu0 %v477_v57  ;;  %v464_v57 = vld [vmem:[%s1699_s6 + $0x20] sm:$0xff] }
  0x4b   :  { %565 = vmatpush.msrb.mxu3 %v467_v53  ;;  %v646_v53 = vld [vmem:[%s1700_s7 + $0x40] sm:$0xff] }
  0x4c   :  { %507 = vmatpush.msrb.mxu0 %v476_v60  ;;  %v462_v60 = vld [vmem:[%s1699_s6 + $0x10] sm:$0xff] }
  0x4d   :  { %566 = vmatpush.msrb.mxu3 %v466_v54 }
  0x4f   :  { %567 = vmatpush.msrb.mxu3 %v465_v55  ;;  %v645_v55 = vld [vmem:[%s1700_s7 + $0x38] sm:$0xff] }
  0x50   :  { %964 = vmatmul.msk.f32.gmra.mxu1 %vm330_vm0, %v75_v34 }
  0x51   :  { %568 = vmatpush.msrb.mxu3 %v464_v57 }
  0x53   :  { %569 = vmatpush.msrb.mxu3 %v463_v58  ;;  %v643_v58 = vld [vmem:[%s1700_s7 + $0x28] sm:$0xff] }
  0x55   :  { %570 = vmatpush.msrb.mxu3 %v462_v60  ;;  %v642_v60 = vld [vmem:[%s1700_s7 + $0x20] sm:$0xff] }
  0x57   :  { %571 = vmatpush.msrb.mxu3 %v461_v61 }
  0x58   :  { %965 = vmatmul.msk.f32.gmra.mxu1 %vm330_vm0, %v76_v44 }
  0x59   :  { %572 = vmatpush.msrb.mxu3 %v460_v63  ;;  %v641_v63 = vld [vmem:[%s1700_s7 + $0x18] sm:$0xff] }
  0x60   :  { %966 = vmatmul.msk.f32.gmra.mxu1 %vm330_vm0, %v77_v56 }
  0x68   :  { %967 = vmatmul.msk.f32.gmra.mxu1 %vm330_vm0, %v78_v1 }
  0x6a   :  { %v115_v5 = vpop.permute.xlu2 %114 }
  0x6b   :  { %vm153_vm3 = vcmp.eq.s32.totalorder %v1341_v3, %v115_v5 }
  0x6c   :  { %v1348_v8 = vsel %vm153_vm3, 1.0, %v1099_v7 }
  0x6d   :  { %944 = vmatmul.msk.f32.vlgmr.msra.gmra.mxu3 %vm212_vm2, %v1348_v8  ;;  %977 = vmatmul.msk.f32.vlgmr.msra.gmra.mxu2 %vm212_vm2, %v1348_v8 }
  0x70   :  { %968 = vmatmul.msk.f32.gmra.mxu1 %vm330_vm0, %v79_v9 }
  0x72   :  { %v118_v12 = vpop.permute.xlu2 %117 }
  0x73   :  { %vm154_vm4 = vcmp.eq.s32.totalorder %v1341_v3, %v118_v12 }
  0x74   :  { %v1364_v13 = vsel %vm154_vm4, 1.0, %v1099_v7 }
  0x75   :  { %945 = vmatmul.msk.f32.gmra.mxu3 %vm212_vm2, %v1364_v13  ;;  %978 = vmatmul.msk.f32.gmra.mxu2 %vm212_vm2, %v1364_v13 }
  0x78   :  { %969 = vmatmul.msk.f32.gmra.mxu1 %vm330_vm0, %v80_v14 }
  0x7a   :  { %v1377_v15 = vpop.permute.xlu2 %126 }
  0x7b   :  { %vm157_vm14 = vcmp.eq.s32.totalorder %v1341_v3, %v1377_v15 }
  0x7c   :  { %v931_v45 = vsel %vm157_vm14, 1.0, %v1099_v7 }
  0x80   :  { %v109_v17 = vpop.permute.xlu1 %108  ;;  %v103_v18 = vpop.permute.xlu0 %102  ;;  %970 = vmatmul.msk.f32.gmra.mxu1 %vm330_vm0, %v81_v16 }
  0x81   :  { %vm149_vm5 = vcmp.eq.s32.totalorder %v1341_v3, %v103_v18  ;;  %vm151_vm9 = vcmp.eq.s32.totalorder %v1341_v3, %v109_v17 }
  0x82   :  { %v923_v19 = vsel %vm149_vm5, 1.0, %v1099_v7  ;;  %v136_v20 = vpop.permute.xlu2 %135  ;;  %v925_v32 = vsel %vm151_vm9, 1.0, %v1099_v7 }
  0x83   :  { %940 = vmatmul.msk.f32.vlgmr.msra.gmra.mxu0 %vm212_vm2, %v923_v19  ;;  %vm160_vm6 = vcmp.eq.s32.totalorder %v1341_v3, %v136_v20 }
  0x84   :  { %v1388_v21 = vsel %vm160_vm6, 1.0, %v1099_v7 }
  0x88   :  { %v112_v24 = vpop.permute.xlu1 %111  ;;  %v106_v25 = vpop.permute.xlu0 %105  ;;  %971 = vmatmul.msk.f32.gmra.mxu1 %vm330_vm0, %v82_v23 }
  0x89   :  { %vm150_vm7 = vcmp.eq.s32.totalorder %v1341_v3, %v106_v25  ;;  %vm152_vm11 = vcmp.eq.s32.totalorder %v1341_v3, %v112_v24 }
  0x8a   :  { %v924_v26 = vsel %vm150_vm7, 1.0, %v1099_v7  ;;  %v145_v27 = vpop.permute.xlu2 %144  ;;  %v926_v39 = vsel %vm152_vm11, 1.0, %v1099_v7 }
  0x8b   :  { %941 = vmatmul.msk.f32.gmra.mxu0 %vm212_vm2, %v924_v26  ;;  %vm163_vm8 = vcmp.eq.s32.totalorder %v1341_v3, %v145_v27 }
  0x8c   :  { %v1402_v28 = vsel %vm163_vm8, 1.0, %v1099_v7 }
  0x8d   :  { %v396_v56 = vpop.f32.mrf.mxu1 }
  0x90   :  { %v124_v31 = vpop.permute.xlu1 %123  ;;  %v121_v33 = vpop.permute.xlu0 %120  ;;  %990 = vmatmul.msk.f32.vlgmr.msrb.gmra.mxu1 %vm212_vm2, %v923_v19 }
  0x91   :  { %vm155_vm10 = vcmp.eq.s32.totalorder %v1341_v3, %v121_v33  ;;  %vm156_vm12 = vcmp.eq.s32.totalorder %v1341_v3, %v124_v31 }
  0x92   :  { %v929_v34 = vsel %vm155_vm10, 1.0, %v1099_v7  ;;  %v930_v40 = vsel %vm156_vm12, 1.0, %v1099_v7 }
  0x93   :  { %942 = vmatmul.msk.f32.gmra.mxu0 %vm212_vm2, %v925_v32  ;;  %946 = vmatmul.msk.f32.gmra.mxu3 %vm212_vm2, %v929_v34 }
  0x94   :  { %979 = vmatmul.msk.f32.gmra.mxu2 %vm212_vm2, %v929_v34 }
  0x95   :  { %v399_v59 = vpop.f32.mrf.mxu1 }
  0x98   :  { %v133_v36 = vpop.permute.xlu1 %132  ;;  %v130_v37 = vpop.permute.xlu0 %129  ;;  %991 = vmatmul.msk.f32.gmra.mxu1 %vm212_vm2, %v924_v26 }
  0x99   :  { %vm159_vm13 = vcmp.eq.s32.totalorder %v1341_v3, %v133_v36  ;;  %vm158_vm3 = vcmp.eq.s32.totalorder %v1341_v3, %v130_v37 }
  0x9a   :  { %v1426_v38 = vsel %vm159_vm13, 1.0, %v1099_v7  ;;  %v932_v50 = vsel %vm158_vm3, 1.0, %v1099_v7 }
  0x9b   :  { %943 = vmatmul.msk.f32.gmra.mxu0 %vm212_vm2, %v926_v39  ;;  %947 = vmatmul.msk.f32.gmra.mxu3 %vm212_vm2, %v930_v40 }
  0x9c   :  { %980 = vmatmul.msk.f32.gmra.mxu2 %vm212_vm2, %v930_v40 }
  0x9d   :  { %v402_v62 = vpop.f32.mrf.mxu1 }
  0xa0   :  { %v142_v42 = vpop.permute.xlu1 %141  ;;  %v139_v43 = vpop.permute.xlu0 %138  ;;  %992 = vmatmul.msk.f32.gmra.mxu1 %vm212_vm2, %v925_v32 }
  0xa1   :  { %vm162_vm15 = vcmp.eq.s32.totalorder %v1341_v3, %v142_v42  ;;  %vm161_vm1 = vcmp.eq.s32.totalorder %v1341_v3, %v139_v43 }
  0xa2   :  { %v1441_v44 = vsel %vm162_vm15, 1.0, %v1099_v7  ;;  %v935_v46 = vsel %vm161_vm1, 1.0, %v1099_v7 }
  0xa3   :  { %948 = vmatmul.msk.f32.gmra.mxu3 %vm212_vm2, %v931_v45  ;;  %973 = vmatmul.msk.f32.vlgmr.msrb.gmra.mxu0 %vm212_vm2, %v923_v19 }
  0xa4   :  { %981 = vmatmul.msk.f32.gmra.mxu2 %vm212_vm2, %v931_v45 }
  0xa5   :  { %v405_v0 = vpop.f32.mrf.mxu1 }
  0xa8   :  { %v148_v49 = vpop.permute.xlu0 %147  ;;  %993 = vmatmul.msk.f32.gmra.mxu1 %vm212_vm2, %v926_v39 }
  0xa9   :  { %vm164_vm4 = vcmp.eq.s32.totalorder %v1341_v3, %v148_v49 }
  0xaa   :  { %v938_v51 = vsel %vm164_vm4, 1.0, %v1099_v7 }
  0xab   :  { %949 = vmatmul.msk.f32.gmra.mxu3 %vm212_vm2, %v932_v50  ;;  %974 = vmatmul.msk.f32.gmra.mxu0 %vm212_vm2, %v924_v26 }
  0xac   :  { %982 = vmatmul.msk.f32.gmra.mxu2 %vm212_vm2, %v932_v50 }
  0xad   :  { %v408_v1 = vpop.f32.mrf.mxu1 }
  0xb0   :  { %994 = vmatmul.msk.f32.gmra.mxu1 %vm212_vm2, %v1348_v8 }
  0xb3   :  { %950 = vmatmul.msk.f32.gmra.mxu3 %vm212_vm2, %v1426_v38  ;;  %975 = vmatmul.msk.f32.gmra.mxu0 %vm212_vm2, %v925_v32 }
  0xb4   :  { %983 = vmatmul.msk.f32.gmra.mxu2 %vm212_vm2, %v1426_v38 }
  0xb5   :  { %v411_v2 = vpop.f32.mrf.mxu1 }
  0xb8   :  { %995 = vmatmul.msk.f32.gmra.mxu1 %vm212_vm2, %v1364_v13 }
  0xbb   :  { %951 = vmatmul.msk.f32.gmra.mxu3 %vm212_vm2, %v1388_v21  ;;  %976 = vmatmul.msk.f32.gmra.mxu0 %vm212_vm2, %v926_v39 }
  0xbc   :  { %984 = vmatmul.msk.f32.gmra.mxu2 %vm212_vm2, %v1388_v21 }
  0xbd   :  { %v414_v3 = vpop.f32.mrf.mxu1 }
  0xc0   :  { %996 = vmatmul.msk.f32.gmra.mxu1 %vm212_vm2, %v929_v34 }
  0xc3   :  { %952 = vmatmul.msk.f32.gmra.mxu3 %vm212_vm2, %v935_v46 }
  0xc4   :  { %985 = vmatmul.msk.f32.gmra.mxu2 %vm212_vm2, %v935_v46 }
  0xc5   :  { %v417_v8 = vpop.f32.mrf.mxu1 }
  0xc8   :  { %997 = vmatmul.msk.f32.gmra.mxu1 %vm212_vm2, %v930_v40  ;;  %v653_v40 = vld [vmem:[%s1700_s7 + $0x78] sm:$0xff] }
  0xc9   :  { %735 = vmatpush.msra.mxu0 %v653_v40  ;;  %v826_v40 = vld [vmem:[%s1701_s8 + $0x50] sm:$0xff] }
  0xcb   :  { %953 = vmatmul.msk.f32.gmra.mxu3 %vm212_vm2, %v1441_v44  ;;  %736 = vmatpush.msra.mxu0 %v652_v41 }
  0xcc   :  { %986 = vmatmul.msk.f32.gmra.mxu2 %vm212_vm2, %v1441_v44 }
  0xcd   :  { %v420_v27 = vpop.f32.mrf.mxu1 }
  0xd0   :  { %998 = vmatmul.msk.f32.gmra.mxu1 %vm212_vm2, %v931_v45  ;;  %v650_v45 = vld [vmem:[%s1700_s7 + $0x60] sm:$0xff] }
  0xd3   :  { %954 = vmatmul.msk.f32.gmra.mxu3 %vm212_vm2, %v1402_v28 }
  0xd4   :  { %987 = vmatmul.msk.f32.gmra.mxu2 %vm212_vm2, %v1402_v28 }
  0xd5   :  { %v423_v31 = vpop.f32.mrf.mxu1 }
  0xd8   :  { %999 = vmatmul.msk.f32.gmra.mxu1 %vm212_vm2, %v932_v50 }
  0xdb   :  { %955 = vmatmul.msk.f32.gmra.mxu3 %vm212_vm2, %v938_v51 }
  0xdc   :  { %988 = vmatmul.msk.f32.gmra.mxu2 %vm212_vm2, %v938_v51 }
  0xdd   :  { %v426_v36 = vpop.f32.mrf.mxu1 }
  0xe0   :  { %1000 = vmatmul.msk.f32.gmra.mxu1 %vm212_vm2, %v1426_v38 }
  0xe5   :  { %v429_v42 = vpop.f32.mrf.mxu1 }
  0xe8   :  { %1001 = vmatmul.msk.f32.gmra.mxu1 %vm212_vm2, %v1388_v21 }
  0xed   :  { %v432_v52 = vpop.f32.mrf.mxu1 }
  0xf0   :  { %1002 = vmatmul.msk.f32.gmra.mxu1 %vm212_vm2, %v935_v46  ;;  %v294_v7 = vpop.f32.mrf.mxu3 }
  0xf1   :  { %v409_v20 = vadd.f32 %v408_v1, %v294_v7 }
  0xf3   :  { %v448_v21 = vmax.f32 %v409_v20, 0.0 }
  0xf5   :  { %v435_v61 = vpop.f32.mrf.mxu1 }
  0xf8   :  { %1003 = vmatmul.msk.f32.gmra.mxu1 %vm212_vm2, %v1441_v44  ;;  %v297_v12 = vpop.f32.mrf.mxu3  ;;  %v651_v44 = vld [vmem:[%s1700_s7 + $0x68] sm:$0xff] }
  0xf9   :  { %v412_v23 = vadd.f32 %v411_v2, %v297_v12  ;;  %737 = vmatpush.msra.mxu0 %v651_v44 }
  0xfb   :  { %v449_v24 = vmax.f32 %v412_v23, 0.0  ;;  %738 = vmatpush.msra.mxu0 %v650_v45  ;;  %v830_v23 = vld [vmem:[%s1701_s8 + $0x70] sm:$0xff]  ;;  %v825_v45 = vld [vmem:[%s1701_s8 + $0x48] sm:$0xff] }
  0xfd   :  { %739 = vmatpush.msra.mxu0 %v649_v47 }
  0xff   :  { %740 = vmatpush.msra.mxu0 %v648_v48 }
 0x100   :  { %v282_v4 = vpop.f32.mrf.mxu0  ;;  %1004 = vmatmul.msk.f32.gmra.mxu1 %vm212_vm2, %v1402_v28 }
 0x101   :  { %v397_v5 = vadd.f32 %v396_v56, %v282_v4  ;;  %v644_v56 = vld [vmem:[%s1700_s7 + $0x30] sm:$0xff] }
 0x103   :  { %v444_v6 = vmax.f32 %v397_v5, 0.0  ;;  %v638_v5 = vld [vmem:[%s1700_s7] sm:$0xff] }
 0x105   :  { %573 = vmatmul.f32.vlgmr.msrb.gmra.mxu3 %v444_v6  ;;  %v438_v6 = vpop.f32.mrf.mxu1 }
 0x108   :  { %v285_v9 = vpop.f32.mrf.mxu0  ;;  %1005 = vmatmul.msk.f32.gmra.mxu1 %vm212_vm2, %v938_v51  ;;  %v647_v51 = vld [vmem:[%s1700_s7 + $0x48] sm:$0xff] }
 0x109   :  { %v400_v10 = vadd.f32 %v399_v59, %v285_v9  ;;  %741 = vmatpush.msra.mxu0 %v647_v51  ;;  %v823_v51 = vld [vmem:[%s1701_s8 + $0x38] sm:$0xff] }
 0x10b   :  { %v445_v11 = vmax.f32 %v400_v10, 0.0  ;;  %742 = vmatpush.msra.mxu0 %v646_v53 }
 0x10d   :  { %576 = vmatmul.f32.gmra.mxu3 %v445_v11  ;;  %743 = vmatpush.msra.mxu0 %v645_v55  ;;  %v441_v10 = vpop.f32.mrf.mxu1 }
 0x10f   :  { %744 = vmatpush.msra.mxu0 %v644_v56  ;;  %v822_v56 = vld [vmem:[%s1701_s8 + $0x30] sm:$0xff] }
 0x110   :  { %v288_v13 = vpop.f32.mrf.mxu0 }
 0x111   :  { %v403_v14 = vadd.f32 %v402_v62, %v288_v13  ;;  %745 = vmatpush.msra.mxu0 %v643_v58 }
 0x113   :  { %v446_v15 = vmax.f32 %v403_v14, 0.0  ;;  %746 = vmatpush.msra.mxu0 %v642_v60  ;;  %v821_v60 = vld [vmem:[%s1701_s8 + $0x28] sm:$0xff] }
 0x115   :  { %579 = vmatmul.f32.gmra.mxu3 %v446_v15  ;;  %747 = vmatpush.msra.mxu0 %v641_v63 }
 0x116   :  { %v300_v18 = vpop.f32.mrf.mxu3 }
 0x117   :  { %v415_v26 = vadd.f32 %v414_v3, %v300_v18  ;;  %v639_v3 = vld [vmem:[%s1700_s7 + $0x8] sm:$0xff]  ;;  %v831_v18 = vld [vmem:[%s1701_s8 + $0x78] sm:$0xff] }
 0x118   :  { %v291_v16 = vpop.f32.mrf.mxu0  ;;  %836 = vmatpush.msrb.mxu2 %v831_v18 }
 0x119   :  { %v406_v17 = vadd.f32 %v405_v0, %v291_v16  ;;  %v450_v28 = vmax.f32 %v415_v26, 0.0  ;;  %v640_v0 = vld [vmem:[%s1700_s7 + $0x10] sm:$0xff] }
 0x11a   :  { %748 = vmatpush.msra.mxu0 %v640_v0  ;;  %837 = vmatpush.msrb.mxu2 %v830_v23 }
 0x11b   :  { %v447_v19 = vmax.f32 %v406_v17, 0.0 }
 0x11c   :  { %749 = vmatpush.msra.mxu0 %v639_v3 }
 0x11d   :  { %582 = vmatmul.f32.gmra.mxu3 %v447_v19 }
 0x11e   :  { %v303_v22 = vpop.f32.mrf.mxu3  ;;  %750 = vmatpush.msra.mxu0 %v638_v5 }
 0x11f   :  { %v418_v29 = vadd.f32 %v417_v8, %v303_v22 }
 0x120   :  { %v509_v13 = vpop.f32.mrf.mxu0 }
 0x121   :  { %v451_v32 = vmax.f32 %v418_v29, 0.0 }
 0x125   :  { %585 = vmatmul.f32.gmra.mxu3 %v448_v21  ;;  %v521_v21 = vpop.f32.mrf.mxu2 }
 0x126   :  { %v306_v25 = vpop.f32.mrf.mxu3 }
 0x127   :  { %v421_v33 = vadd.f32 %v420_v27, %v306_v25 }
 0x128   :  { %v512_v17 = vpop.f32.mrf.mxu0 }
 0x129   :  { %v452_v35 = vmax.f32 %v421_v33, 0.0 }
 0x12d   :  { %588 = vmatmul.f32.gmra.mxu3 %v449_v24  ;;  %v524_v29 = vpop.f32.mrf.mxu2 }
 0x12e   :  { %v309_v30 = vpop.f32.mrf.mxu3 }
 0x12f   :  { %v424_v37 = vadd.f32 %v423_v31, %v309_v30 }
 0x130   :  { %v515_v24 = vpop.f32.mrf.mxu0 }
 0x131   :  { %v453_v38 = vmax.f32 %v424_v37, 0.0 }
 0x135   :  { %591 = vmatmul.f32.gmra.mxu3 %v450_v28  ;;  %v829_v28 = vld [vmem:[%s1701_s8 + $0x68] sm:$0xff] }
 0x136   :  { %v312_v34 = vpop.f32.mrf.mxu3  ;;  %838 = vmatpush.msrb.mxu2 %v829_v28 }
 0x137   :  { %v427_v43 = vadd.f32 %v426_v36, %v312_v34  ;;  %v828_v34 = vld [vmem:[%s1701_s8 + $0x60] sm:$0xff]  ;;  %v527_v36 = vpop.f32.mrf.mxu2 }
 0x138   :  { %v518_v30 = vpop.f32.mrf.mxu0  ;;  %839 = vmatpush.msrb.mxu2 %v828_v34 }
 0x139   :  { %v454_v46 = vmax.f32 %v427_v43, 0.0 }
 0x13d   :  { %594 = vmatmul.f32.gmra.mxu3 %v451_v32 }
 0x13e   :  { %v315_v39 = vpop.f32.mrf.mxu3 }
 0x13f   :  { %v430_v50 = vadd.f32 %v429_v42, %v315_v39  ;;  %v530_v41 = vpop.f32.mrf.mxu2 }
 0x141   :  { %v455_v54 = vmax.f32 %v430_v50, 0.0  ;;  %v824_v50 = vld [vmem:[%s1701_s8 + $0x40] sm:$0xff] }
 0x145   :  { %597 = vmatmul.f32.gmra.mxu3 %v452_v35  ;;  %v827_v35 = vld [vmem:[%s1701_s8 + $0x58] sm:$0xff] }
 0x146   :  { %v318_v49 = vpop.f32.mrf.mxu3  ;;  %840 = vmatpush.msrb.mxu2 %v827_v35 }
 0x147   :  { %v433_v57 = vadd.f32 %v432_v52, %v318_v49  ;;  %v533_v48 = vpop.f32.mrf.mxu2 }
 0x148   :  { %841 = vmatpush.msrb.mxu2 %v826_v40 }
 0x149   :  { %v456_v62 = vmax.f32 %v433_v57, 0.0 }
 0x14a   :  { %842 = vmatpush.msrb.mxu2 %v825_v45 }
 0x14c   :  { %843 = vmatpush.msrb.mxu2 %v824_v50 }
 0x14d   :  { %600 = vmatmul.f32.gmra.mxu3 %v453_v38 }
 0x14e   :  { %v321_v59 = vpop.f32.mrf.mxu3  ;;  %844 = vmatpush.msrb.mxu2 %v823_v51 }
 0x14f   :  { %v436_v1 = vadd.f32 %v435_v61, %v321_v59  ;;  %v536_v55 = vpop.f32.mrf.mxu2 }
 0x150   :  { %845 = vmatpush.msrb.mxu2 %v822_v56 }
 0x151   :  { %v457_v4 = vmax.f32 %v436_v1, 0.0  ;;  %v820_v1 = vld [vmem:[%s1701_s8 + $0x20] sm:$0xff] }
 0x152   :  { %846 = vmatpush.msrb.mxu2 %v821_v60 }
 0x154   :  { %847 = vmatpush.msrb.mxu2 %v820_v1 }
 0x155   :  { %603 = vmatmul.f32.gmra.mxu3 %v454_v46 }
 0x156   :  { %v324_v2 = vpop.f32.mrf.mxu3 }
 0x157   :  { %v439_v7 = vadd.f32 %v438_v6, %v324_v2  ;;  %v539_v61 = vpop.f32.mrf.mxu2  ;;  %v819_v2 = vld [vmem:[%s1701_s8 + $0x18] sm:$0xff] }
 0x158   :  { %848 = vmatpush.msrb.mxu2 %v819_v2 }
 0x159   :  { %v458_v8 = vmax.f32 %v439_v7, 0.0  ;;  %v818_v7 = vld [vmem:[%s1701_s8 + $0x10] sm:$0xff] }
 0x15a   :  { %849 = vmatpush.msrb.mxu2 %v818_v7 }
 0x15d   :  { %606 = vmatmul.f32.gmra.mxu3 %v455_v54 }
 0x15e   :  { %v327_v9 = vpop.f32.mrf.mxu3 }
 0x15f   :  { %v442_v11 = vadd.f32 %v441_v10, %v327_v9  ;;  %v542_v3 = vpop.f32.mrf.mxu2 }
 0x161   :  { %v459_v12 = vmax.f32 %v442_v11, 0.0 }
 0x165   :  { %609 = vmatmul.f32.gmra.mxu3 %v456_v62 }
 0x167   :  { %v545_v10 = vpop.f32.mrf.mxu2 }
 0x16d   :  { %612 = vmatmul.f32.gmra.mxu3 %v457_v4 }
 0x16f   :  { %v548_v18 = vpop.f32.mrf.mxu2 }
 0x175   :  { %615 = vmatmul.f32.gmra.mxu3 %v458_v8 }
 0x177   :  { %v551_v23 = vpop.f32.mrf.mxu2 }
 0x17d   :  { %618 = vmatmul.f32.gmra.mxu3 %v459_v12  ;;  %v817_v12 = vld [vmem:[%s1701_s8 + $0x8] sm:$0xff] }
 0x17e   :  { %850 = vmatpush.msrb.mxu2 %v817_v12 }
 0x17f   :  { %v554_v28 = vpop.f32.mrf.mxu2 }
 0x188   :  { %v574_v14 = vpop.f32.mrf.mxu3 }
 0x189   :  { %v575_v15 = vadd.f32 %v574_v14, %v509_v13  ;;  %v816_v13 = vld [vmem:[%s1701_s8] sm:$0xff] }
 0x18a   :  { %851 = vmatpush.msrb.mxu2 %v816_v13 }
 0x18b   :  { %v622_v16 = vmax.f32 %v575_v15, 0.0 }
 0x18d   :  { %751 = vmatmul.f32.vlgmr.msra.gmra.mxu0 %v622_v16  ;;  %v687_v16 = vpop.f32.mrf.mxu1 }
 0x190   :  { %v577_v19 = vpop.f32.mrf.mxu3 }
 0x191   :  { %v578_v20 = vadd.f32 %v577_v19, %v512_v17 }
 0x193   :  { %v623_v22 = vmax.f32 %v578_v20, 0.0 }
 0x195   :  { %754 = vmatmul.f32.gmra.mxu0 %v623_v22  ;;  %v690_v22 = vpop.f32.mrf.mxu1 }
 0x198   :  { %v580_v25 = vpop.f32.mrf.mxu3 }
 0x199   :  { %v581_v26 = vadd.f32 %v580_v25, %v515_v24 }
 0x19b   :  { %v624_v27 = vmax.f32 %v581_v26, 0.0 }
 0x19d   :  { %757 = vmatmul.f32.gmra.mxu0 %v624_v27  ;;  %v693_v27 = vpop.f32.mrf.mxu1 }
 0x1a0   :  { %v583_v31 = vpop.f32.mrf.mxu3 }
 0x1a1   :  { %v584_v32 = vadd.f32 %v583_v31, %v518_v30 }
 0x1a3   :  { %v625_v33 = vmax.f32 %v584_v32, 0.0 }
 0x1a5   :  { %760 = vmatmul.f32.gmra.mxu0 %v625_v33  ;;  %v696_v32 = vpop.f32.mrf.mxu1 }
 0x1a8   :  { %v586_v37 = vpop.f32.mrf.mxu3 }
 0x1a9   :  { %v587_v38 = vadd.f32 %v586_v37, %v521_v21 }
 0x1ab   :  { %v626_v39 = vmax.f32 %v587_v38, 0.0 }
 0x1ad   :  { %763 = vmatmul.f32.gmra.mxu0 %v626_v39  ;;  %v699_v38 = vpop.f32.mrf.mxu1 }
 0x1b0   :  { %v589_v42 = vpop.f32.mrf.mxu3 }
 0x1b1   :  { %v590_v43 = vadd.f32 %v589_v42, %v524_v29 }
 0x1b3   :  { %v627_v44 = vmax.f32 %v590_v43, 0.0 }
 0x1b5   :  { %766 = vmatmul.f32.gmra.mxu0 %v627_v44  ;;  %v702_v43 = vpop.f32.mrf.mxu1 }
 0x1b8   :  { %v592_v46 = vpop.f32.mrf.mxu3 }
 0x1b9   :  { %v593_v47 = vadd.f32 %v592_v46, %v527_v36 }
 0x1bb   :  { %v628_v49 = vmax.f32 %v593_v47, 0.0 }
 0x1bd   :  { %769 = vmatmul.f32.gmra.mxu0 %v628_v49  ;;  %v705_v47 = vpop.f32.mrf.mxu1 }
 0x1c0   :  { %v595_v52 = vpop.f32.mrf.mxu3 }
 0x1c1   :  { %v596_v53 = vadd.f32 %v595_v52, %v530_v41 }
 0x1c3   :  { %v629_v54 = vmax.f32 %v596_v53, 0.0 }
 0x1c5   :  { %772 = vmatmul.f32.gmra.mxu0 %v629_v54  ;;  %v708_v51 = vpop.f32.mrf.mxu1 }
 0x1c8   :  { %v598_v57 = vpop.f32.mrf.mxu3 }
 0x1c9   :  { %v599_v58 = vadd.f32 %v598_v57, %v533_v48 }
 0x1cb   :  { %v630_v59 = vmax.f32 %v599_v58, 0.0 }
 0x1cd   :  { %775 = vmatmul.f32.gmra.mxu0 %v630_v59  ;;  %v711_v57 = vpop.f32.mrf.mxu1 }
 0x1d0   :  { %v601_v62 = vpop.f32.mrf.mxu3 }
 0x1d1   :  { %v602_v63 = vadd.f32 %v601_v62, %v536_v55 }
 0x1d3   :  { %v631_v0 = vmax.f32 %v602_v63, 0.0 }
 0x1d5   :  { %778 = vmatmul.f32.gmra.mxu0 %v631_v0  ;;  %v714_v62 = vpop.f32.mrf.mxu1 }
 0x1d8   :  { %v604_v4 = vpop.f32.mrf.mxu3 }
 0x1d9   :  { %v605_v5 = vadd.f32 %v604_v4, %v539_v61 }
 0x1db   :  { %v632_v6 = vmax.f32 %v605_v5, 0.0 }
 0x1dd   :  { %781 = vmatmul.f32.gmra.mxu0 %v632_v6  ;;  %v717_v2 = vpop.f32.mrf.mxu1 }
 0x1e0   :  { %v607_v8 = vpop.f32.mrf.mxu3 }
 0x1e1   :  { %v608_v9 = vadd.f32 %v607_v8, %v542_v3 }
 0x1e3   :  { %v633_v11 = vmax.f32 %v608_v9, 0.0 }
 0x1e5   :  { %784 = vmatmul.f32.gmra.mxu0 %v633_v11  ;;  %v720_v6 = vpop.f32.mrf.mxu1 }
 0x1e8   :  { %v610_v14 = vpop.f32.mrf.mxu3 }
 0x1e9   :  { %v611_v15 = vadd.f32 %v610_v14, %v545_v10 }
 0x1eb   :  { %v634_v17 = vmax.f32 %v611_v15, 0.0 }
 0x1ed   :  { %787 = vmatmul.f32.gmra.mxu0 %v634_v17  ;;  %v723_v12 = vpop.f32.mrf.mxu1 }
 0x1f0   :  { %v613_v19 = vpop.f32.mrf.mxu3 }
 0x1f1   :  { %v614_v20 = vadd.f32 %v613_v19, %v548_v18 }
 0x1f3   :  { %v635_v21 = vmax.f32 %v614_v20, 0.0 }
 0x1f5   :  { %790 = vmatmul.f32.gmra.mxu0 %v635_v21  ;;  %v726_v17 = vpop.f32.mrf.mxu1 }
 0x1f8   :  { %v616_v24 = vpop.f32.mrf.mxu3 }
 0x1f9   :  { %v617_v25 = vadd.f32 %v616_v24, %v551_v23 }
 0x1fb   :  { %v636_v26 = vmax.f32 %v617_v25, 0.0 }
 0x1fd   :  { %793 = vmatmul.f32.gmra.mxu0 %v636_v26  ;;  %v729_v21 = vpop.f32.mrf.mxu1 }
 0x200   :  { %v619_v29 = vpop.f32.mrf.mxu3 }
 0x201   :  { %v620_v30 = vadd.f32 %v619_v29, %v554_v28  ;;  %v1041_v29 = vld [vmem:[%s1702_s9] ss:$0 sm:$0xff] }
 0x203   :  { %v637_v31 = vmax.f32 %v620_v30, 0.0 }
 0x205   :  { %796 = vmatmul.f32.gmra.mxu0 %v637_v31  ;;  %v732_v25 = vpop.f32.mrf.mxu1 }
 0x20a   :  { %v752_v33 = vpop.f32.mrf.mxu0 }
 0x20b   :  { %v753_v34 = vadd.f32 %v752_v33, %v687_v16 }
 0x20d   :  { %v800_v35 = vmax.f32 %v753_v34, 0.0 }
 0x20f   :  { %852 = vmatmul.f32.vlgmr.msrb.gmra.mxu2 %v800_v35 }
 0x212   :  { %v755_v36 = vpop.f32.mrf.mxu0 }
 0x213   :  { %v756_v37 = vadd.f32 %v755_v36, %v690_v22 }
 0x215   :  { %v801_v39 = vmax.f32 %v756_v37, 0.0 }
 0x217   :  { %855 = vmatmul.f32.gmra.mxu2 %v801_v39 }
 0x21a   :  { %v758_v40 = vpop.f32.mrf.mxu0 }
 0x21b   :  { %v759_v41 = vadd.f32 %v758_v40, %v693_v27 }
 0x21d   :  { %v802_v42 = vmax.f32 %v759_v41, 0.0 }
 0x21f   :  { %858 = vmatmul.f32.gmra.mxu2 %v802_v42 }
 0x222   :  { %v761_v44 = vpop.f32.mrf.mxu0 }
 0x223   :  { %v762_v45 = vadd.f32 %v761_v44, %v696_v32 }
 0x225   :  { %v803_v46 = vmax.f32 %v762_v45, 0.0 }
 0x227   :  { %861 = vmatmul.f32.gmra.mxu2 %v803_v46 }
 0x22a   :  { %v764_v48 = vpop.f32.mrf.mxu0 }
 0x22b   :  { %v765_v49 = vadd.f32 %v764_v48, %v699_v38 }
 0x22d   :  { %v804_v50 = vmax.f32 %v765_v49, 0.0 }
 0x22f   :  { %864 = vmatmul.f32.gmra.mxu2 %v804_v50 }
 0x232   :  { %v767_v52 = vpop.f32.mrf.mxu0 }
 0x233   :  { %v768_v53 = vadd.f32 %v767_v52, %v702_v43 }
 0x235   :  { %v805_v54 = vmax.f32 %v768_v53, 0.0 }
 0x237   :  { %867 = vmatmul.f32.gmra.mxu2 %v805_v54 }
 0x23a   :  { %v770_v55 = vpop.f32.mrf.mxu0 }
 0x23b   :  { %v771_v56 = vadd.f32 %v770_v55, %v705_v47 }
 0x23d   :  { %v806_v58 = vmax.f32 %v771_v56, 0.0 }
 0x23f   :  { %870 = vmatmul.f32.gmra.mxu2 %v806_v58 }
 0x242   :  { %v773_v59 = vpop.f32.mrf.mxu0 }
 0x243   :  { %v774_v60 = vadd.f32 %v773_v59, %v708_v51 }
 0x245   :  { %v807_v61 = vmax.f32 %v774_v60, 0.0 }
 0x247   :  { %873 = vmatmul.f32.gmra.mxu2 %v807_v61 }
 0x24a   :  { %v776_v63 = vpop.f32.mrf.mxu0 }
 0x24b   :  { %v777_v0 = vadd.f32 %v776_v63, %v711_v57 }
 0x24d   :  { %v808_v1 = vmax.f32 %v777_v0, 0.0 }
 0x24f   :  { %876 = vmatmul.f32.gmra.mxu2 %v808_v1 }
 0x252   :  { %v779_v3 = vpop.f32.mrf.mxu0 }
 0x253   :  { %v780_v4 = vadd.f32 %v779_v3, %v714_v62 }
 0x255   :  { %v809_v5 = vmax.f32 %v780_v4, 0.0 }
 0x257   :  { %879 = vmatmul.f32.gmra.mxu2 %v809_v5 }
 0x25a   :  { %v782_v7 = vpop.f32.mrf.mxu0 }
 0x25b   :  { %v783_v8 = vadd.f32 %v782_v7, %v717_v2 }
 0x25d   :  { %v810_v9 = vmax.f32 %v783_v8, 0.0 }
 0x25f   :  { %882 = vmatmul.f32.gmra.mxu2 %v810_v9 }
 0x262   :  { %v785_v10 = vpop.f32.mrf.mxu0 }
 0x263   :  { %v786_v11 = vadd.f32 %v785_v10, %v720_v6 }
 0x265   :  { %v811_v13 = vmax.f32 %v786_v11, 0.0 }
 0x267   :  { %885 = vmatmul.f32.gmra.mxu2 %v811_v13 }
 0x26a   :  { %v788_v14 = vpop.f32.mrf.mxu0 }
 0x26b   :  { %v789_v15 = vadd.f32 %v788_v14, %v723_v12 }
 0x26d   :  { %v812_v16 = vmax.f32 %v789_v15, 0.0 }
 0x26f   :  { %888 = vmatmul.f32.gmra.mxu2 %v812_v16 }
 0x272   :  { %v791_v18 = vpop.f32.mrf.mxu0 }
 0x273   :  { %v792_v19 = vadd.f32 %v791_v18, %v726_v17 }
 0x275   :  { %v813_v20 = vmax.f32 %v792_v19, 0.0 }
 0x277   :  { %891 = vmatmul.f32.gmra.mxu2 %v813_v20 }
 0x27a   :  { %v794_v22 = vpop.f32.mrf.mxu0 }
 0x27b   :  { %v795_v23 = vadd.f32 %v794_v22, %v729_v21 }
 0x27d   :  { %v814_v24 = vmax.f32 %v795_v23, 0.0 }
 0x27f   :  { %894 = vmatmul.f32.gmra.mxu2 %v814_v24 }
 0x282   :  { %v797_v26 = vpop.f32.mrf.mxu0 }
 0x283   :  { %v798_v27 = vadd.f32 %v797_v26, %v732_v25 }
 0x285   :  { %v815_v28 = vmax.f32 %v798_v27, 0.0 }
 0x287   :  { %897 = vmatmul.f32.gmra.mxu2 %v815_v28 }
 0x292   :  { %v853_v30 = vpop.f32.mrf.mxu2 }
 0x293   :  { %v854_v31 = vadd.f32 %v1041_v29, %v853_v30 }
 0x295   :  { %901 = vst.msk [vmem:[%s1703_s10] sm:$0xff] %vm330_vm0, %v854_v31 }
 0x29a   :  { %v856_v32 = vpop.f32.mrf.mxu2 }
 0x29b   :  { %v857_v33 = vadd.f32 %v1041_v29, %v856_v32 }
 0x29d   :  { %902 = vst.msk [vmem:[%s1703_s10 + $0x8] sm:$0xff] %vm330_vm0, %v857_v33 }
 0x2a2   :  { %v859_v34 = vpop.f32.mrf.mxu2 }
 0x2a3   :  { %v860_v35 = vadd.f32 %v1041_v29, %v859_v34 }
 0x2a5   :  { %903 = vst.msk [vmem:[%s1703_s10 + $0x10] sm:$0xff] %vm330_vm0, %v860_v35 }
 0x2aa   :  { %v862_v36 = vpop.f32.mrf.mxu2 }
 0x2ab   :  { %v863_v37 = vadd.f32 %v1041_v29, %v862_v36 }
 0x2ad   :  { %904 = vst.msk [vmem:[%s1703_s10 + $0x18] sm:$0xff] %vm330_vm0, %v863_v37 }
 0x2b2   :  { %v865_v38 = vpop.f32.mrf.mxu2 }
 0x2b3   :  { %v866_v39 = vadd.f32 %v1041_v29, %v865_v38 }
 0x2b5   :  { %905 = vst.msk [vmem:[%s1703_s10 + $0x20] sm:$0xff] %vm330_vm0, %v866_v39 }
 0x2ba   :  { %v868_v40 = vpop.f32.mrf.mxu2 }
 0x2bb   :  { %v869_v41 = vadd.f32 %v1041_v29, %v868_v40 }
 0x2bd   :  { %906 = vst.msk [vmem:[%s1703_s10 + $0x28] sm:$0xff] %vm330_vm0, %v869_v41 }
 0x2c2   :  { %v871_v42 = vpop.f32.mrf.mxu2 }
 0x2c3   :  { %v872_v43 = vadd.f32 %v1041_v29, %v871_v42 }
 0x2c5   :  { %907 = vst.msk [vmem:[%s1703_s10 + $0x30] sm:$0xff] %vm330_vm0, %v872_v43 }
 0x2ca   :  { %v874_v44 = vpop.f32.mrf.mxu2 }
 0x2cb   :  { %v875_v45 = vadd.f32 %v1041_v29, %v874_v44 }
 0x2cd   :  { %908 = vst.msk [vmem:[%s1703_s10 + $0x38] sm:$0xff] %vm330_vm0, %v875_v45 }
 0x2d2   :  { %v877_v46 = vpop.f32.mrf.mxu2 }
 0x2d3   :  { %v878_v47 = vadd.f32 %v1041_v29, %v877_v46 }
 0x2d5   :  { %909 = vst.msk [vmem:[%s1703_s10 + $0x40] sm:$0xff] %vm330_vm0, %v878_v47 }
 0x2da   :  { %v880_v48 = vpop.f32.mrf.mxu2 }
 0x2db   :  { %v881_v49 = vadd.f32 %v1041_v29, %v880_v48 }
 0x2dd   :  { %910 = vst.msk [vmem:[%s1703_s10 + $0x48] sm:$0xff] %vm330_vm0, %v881_v49 }
 0x2e2   :  { %v883_v50 = vpop.f32.mrf.mxu2 }
 0x2e3   :  { %v884_v51 = vadd.f32 %v1041_v29, %v883_v50 }
 0x2e5   :  { %911 = vst.msk [vmem:[%s1703_s10 + $0x50] sm:$0xff] %vm330_vm0, %v884_v51 }
 0x2ea   :  { %v886_v52 = vpop.f32.mrf.mxu2 }
 0x2eb   :  { %v887_v53 = vadd.f32 %v1041_v29, %v886_v52 }
 0x2ed   :  { %912 = vst.msk [vmem:[%s1703_s10 + $0x58] sm:$0xff] %vm330_vm0, %v887_v53 }
 0x2f2   :  { %v889_v54 = vpop.f32.mrf.mxu2 }
 0x2f3   :  { %v890_v55 = vadd.f32 %v1041_v29, %v889_v54 }
 0x2f5   :  { %913 = vst.msk [vmem:[%s1703_s10 + $0x60] sm:$0xff] %vm330_vm0, %v890_v55 }
 0x2fa   :  { %v892_v56 = vpop.f32.mrf.mxu2 }
 0x2fb   :  { %v893_v57 = vadd.f32 %v1041_v29, %v892_v56 }
 0x2fd   :  { %914 = vst.msk [vmem:[%s1703_s10 + $0x68] sm:$0xff] %vm330_vm0, %v893_v57 }
 0x302   :  { %v895_v58 = vpop.f32.mrf.mxu2 }
 0x303   :  { %v896_v59 = vadd.f32 %v1041_v29, %v895_v58 }
 0x305   :  { %915 = vst.msk [vmem:[%s1703_s10 + $0x70] sm:$0xff] %vm330_vm0, %v896_v59 }
 0x30a   :  { %v898_v60 = vpop.f32.mrf.mxu2 }
 0x30b   :  { %v899_v61 = vadd.f32 %v1041_v29, %v898_v60 }
 0x30d   :  { %916 = vst.msk [vmem:[%s1703_s10 + $0x78] sm:$0xff] %vm330_vm0, %v899_v61 }
 0x30e   :  { %921 = vsyncpa [#allocation3], 1 }
 0x30f   :  { %922 = vsyncpa [#allocation5], 1 }

</bundles_post_ra>
